<compile_context>
chip_gen: v5e
topology: v5e:2x2
jax: 0.10.0
libtpu: 0.0.40
codegen_flags: <defaults>
</compile_context>

<pallas_src>
import math

import jax
import jax.numpy as jnp
from jax import lax
from jax.experimental import pallas as pl
from jax.experimental.pallas import tpu as pltpu


# -----------------------------------------------------------------------------
# Pallas kernel: y[b, s] = sum_f x[b, f, s] * w[b, f] + noise[b, s] * noise_std
# -----------------------------------------------------------------------------
def _make_linear_prior_kernel(f_chunk, n_chunks, tile_s):
    def kernel(x_ref, w_ref, noise_ref, std_ref, y_ref):
        # x_ref:     (1, F, TILE_S)   VMEM
        # w_ref:     (1, F, 1)        VMEM
        # noise_ref: (1, 1, TILE_S)   VMEM
        # std_ref:   (1,)             SMEM scalar
        # y_ref:     (1, 1, TILE_S)   VMEM (lane-dense output tile)
        def body(c, acc):
            off = pl.multiple_of(c * f_chunk, f_chunk)
            xc = x_ref[0, pl.ds(off, f_chunk), :]   # (f_chunk, TILE_S)
            wc = w_ref[0, pl.ds(off, f_chunk), :]   # (f_chunk, 1)
            # per-lane VPU multiply-add; only a small cross-sublane reduce
            return acc + jnp.sum(xc * wc, axis=0, keepdims=True)

        acc0 = jnp.zeros((1, tile_s), jnp.float32)
        acc = lax.fori_loop(0, n_chunks, body, acc0, unroll=True)
        y_ref[0] = acc + noise_ref[0] * std_ref[0]

    return kernel


def _pick_tile_s(seq_len):
    # Lane-dense tiles (multiples of 128) when possible; otherwise the full dim.
    if seq_len % 128 == 0:
        for t in (1024, 512, 256, 128):
            if seq_len % t == 0:
                return t
    return seq_len


def _pick_f_chunk(num_features):
    # Largest divisor of F that is <= 32 sublanes worth of rows per chunk.
    for c in range(min(num_features, 32), 0, -1):
        if num_features % c == 0:
            return c
    return num_features


def linear_prior_batch(x_bfs, w, noise_b1s, noise_std):
    """x_bfs: (B, F, S) f32, w: (B, F) f32, noise_b1s: (B, 1, S) f32,
    noise_std: (1,) f32 -> y: (B, 1, S) f32."""
    B, F, S = x_bfs.shape
    tile_s = _pick_tile_s(S)
    f_chunk = _pick_f_chunk(F)
    n_chunks = F // f_chunk

    kernel = _make_linear_prior_kernel(f_chunk, n_chunks, tile_s)
    grid = (B, pl.cdiv(S, tile_s))

    return pl.pallas_call(
        kernel,
        out_shape=jax.ShapeDtypeStruct((B, 1, S), jnp.float32),
        grid=grid,
        in_specs=[
            pl.BlockSpec((1, F, tile_s), lambda b, s: (b, 0, s)),
            pl.BlockSpec((1, F, 1), lambda b, s: (b, 0, 0)),
            pl.BlockSpec((1, 1, tile_s), lambda b, s: (b, 0, s)),
            # single scalar on the scalar path, not a padded VMEM tile
            pl.BlockSpec(memory_space=pltpu.MemorySpace.SMEM),
        ],
        out_specs=pl.BlockSpec((1, 1, tile_s), lambda b, s: (b, 0, s)),
        compiler_params=pltpu.CompilerParams(
            # "parallel" on both axes: shards across the 2 TensorCores on v7x,
            # no-op (but harmless) on v5e/v6e.
            dimension_semantics=("parallel", "parallel")),
    )(x_bfs, w.reshape(B, F, 1), noise_b1s, noise_std)


# -----------------------------------------------------------------------------
# JAX mirror of the PyTorch module hierarchy
# -----------------------------------------------------------------------------
class DifferentiableHyperparameter:
    """Supports 'uniform' / 'uniform_int' (what the demo config uses)."""
    # TODO(synk): meta_* distributions (meta_beta, meta_gamma, meta_choice, ...)
    # rely on host-side numpy/scipy sampling + torch.multinomial; no clean
    # Pallas equivalent, so they are not reproduced here.
    # TODO(synk): the 'uniform'-with-fixed-`sample` variant (indicator = None)
    # is not reproduced here either.

    def __init__(self, distribution, embedding_dim, device, **args):
        self.distribution = distribution
        self.embedding_dim = embedding_dim
        self.device = device
        for key in args:
            setattr(self, key, args[key])

        if distribution in ("uniform", "uniform_int"):
            self.sampler_min = self.min
            self.sampler_max = self.max
            self.sampler_mean = (self.max + self.min) / 2
            self.sampler_std = math.sqrt(1 / 12 * (self.max - self.min) ** 2)
        else:
            raise NotImplementedError(f"distribution {distribution} not supported")

    def sample_raw(self, key):
        u = jax.random.uniform(
            key, (), dtype=jnp.float32,
            minval=self.sampler_min, maxval=self.sampler_max)
        if self.distribution == "uniform_int":
            # matches the PyTorch reference: round(np.random.uniform(a, b))
            u = jnp.round(u)
        return u


class DifferentiableHyperparameterList:
    def __init__(self, hyperparameters, embedding_dim, device):
        self.device = device
        hyperparameters = {k: v for k, v in hyperparameters.items() if v}
        self.hyperparameters = {
            hp: DifferentiableHyperparameter(
                embedding_dim=embedding_dim, name=hp, device=device,
                **hyperparameters[hp])
            for hp in hyperparameters
        }

    def sample_parameter_object(self, key):
        names = list(self.hyperparameters)
        keys = jax.random.split(key, len(names))
        s_passed, indicators = {}, {}
        for n, k in zip(names, keys):
            hp = self.hyperparameters[n]
            s = hp.sample_raw(k)
            s_passed[n] = s
            # Indicator = (sample - mean) / std, computed in plain jnp: mean/std
            # are Python constants, so 1/std folds at trace time and XLA fuses
            # the op for free (a Pallas kernel over ~3 floats is pure overhead).
            if hp.sampler_std != 0:
                indicators[n] = (s - hp.sampler_mean) * (1.0 / hp.sampler_std)
            else:
                # min == max degenerate case: mirror the reference's divide-by-0
                indicators[n] = (s - hp.sampler_mean) / hp.sampler_std
        return s_passed, indicators


class DifferentiablePrior:
    def __init__(self, get_batch, hyperparameters, differentiable_hyperparameters, args):
        self.h = hyperparameters
        self.args = args
        self.get_batch = get_batch
        self.differentiable_hyperparameters = DifferentiableHyperparameterList(
            differentiable_hyperparameters,
            embedding_dim=self.h["emsize"],
            device=self.args["device"])

    def forward(self, key):
        k_hp, k_batch = jax.random.split(key)
        (sampled_hyperparameters_passed,
         sampled_hyperparameters_indicators) = \
            self.differentiable_hyperparameters.sample_parameter_object(k_hp)
        hyperparameters = {**self.h, **sampled_hyperparameters_passed}
        x, y, y_, t = self.get_batch(hyperparameters=hyperparameters,
                                     key=k_batch, **self.args)
        return x, y, y_, t, sampled_hyperparameters_indicators


# -----------------------------------------------------------------------------
# Synthetic get_batch (linear regression prior) — hot path in Pallas
# -----------------------------------------------------------------------------
def get_batch(hyperparameters, device, seq_len, batch_size, num_features, key,
              **kwargs):
    kx, kw, kn = jax.random.split(key, 3)
    # Generate directly in the kernel-friendly (B, F, S) layout so the
    # reduction axis F is leading inside the kernel; transpose to the PFN
    # (S, B, F) convention only for the returned x (layout plumbing, not compute).
    x_bfs = jax.random.normal(kx, (batch_size, num_features, seq_len), jnp.float32)
    w = jax.random.normal(kw, (batch_size, num_features), jnp.float32)
    noise = jax.random.normal(kn, (batch_size, 1, seq_len), jnp.float32)
    noise_std = jnp.asarray(hyperparameters["noise_std"], jnp.float32).reshape(1)

    y_b1s = linear_prior_batch(x_bfs, w, noise, noise_std)   # Pallas kernel

    x = jnp.transpose(x_bfs, (2, 0, 1))            # (S, B, F)
    y = jnp.transpose(y_b1s[:, 0, :], (1, 0))      # (S, B)
    y_ = y                                         # regression target == y
    t = jnp.asarray(seq_len // 2, jnp.int32)       # eval-position-style marker
    return x, y, y_, t


# -----------------------------------------------------------------------------
if __name__ == "__main__":
    key = jax.random.PRNGKey(0)

    # Standalone kernel correctness check against a pure-JAX reference.
    kc = jax.random.PRNGKey(0)
    k1, k2, k3 = jax.random.split(kc, 3)
    xt = jax.random.normal(k1, (2, 16, 8), jnp.float32)
    wt = jax.random.normal(k2, (2, 16), jnp.float32)
    nt = jax.random.normal(k3, (2, 1, 8), jnp.float32)
    std = jnp.array([0.1], jnp.float32)
    got = linear_prior_batch(xt, wt, nt, std)[:, 0, :]
    want = jnp.einsum("bfs,bf->bs", xt, wt) + nt[:, 0, :] * 0.1
    assert jnp.allclose(got, want, atol=1e-4, rtol=1e-4), "kernel mismatch vs jnp reference"

    base_hyperparameters = {"emsize": 32, "noise_std": 0.1}
    differentiable_hyperparameters = {
        "noise_std": {"distribution": "uniform", "min": 0.01, "max": 0.5},
        "feature_scale": {"distribution": "uniform", "min": 0.1, "max": 2.0},
        "num_layers": {"distribution": "uniform_int", "min": 1, "max": 4},
    }
    args = {"device": "tpu", "seq_len": 8, "batch_size": 2, "num_features": 16}

    prior = DifferentiablePrior(get_batch, base_hyperparameters,
                                differentiable_hyperparameters, args)
    x, y, y_, t, indicators = prior.forward(key)

    jax.block_until_ready((x, y, y_, t, tuple(indicators.values())))

    assert x.shape == (8, 2, 16) and y.shape == (8, 2) and y_.shape == (8, 2)
    assert len(indicators) == 3
    assert bool(jnp.all(jnp.isfinite(y)))
    print("KERNEL_OK")
</pallas_src>

<mosaic_0001>
module attributes {stable_mosaic.version = 11 : i64} {
  func.func @kernel(%arg0: i32, %arg1: i32, %arg2: memref<1x16x8xf32, #tpu.memory_space<vmem>>, %arg3: memref<1x16x1xf32, #tpu.memory_space<vmem>>, %arg4: memref<1x1x8xf32, #tpu.memory_space<vmem>>, %arg5: memref<1xf32, #tpu.memory_space<smem>>, %arg6: memref<1x1x8xf32, #tpu.memory_space<vmem>>) attributes {dimension_semantics = [#tpu.dimension_semantics<parallel>, #tpu.dimension_semantics<parallel>], iteration_bounds = array<i64: 2, 1>, scalar_prefetch = 0 : i64, scratch_operands = 0 : i64, tpu.core_type = #tpu.core_type<tc>, window_params = [{transform_indices = @transform_0, window_bounds = array<i64: 1, 16, 8>}, {transform_indices = @transform_1, window_bounds = array<i64: 1, 16, 1>}, {transform_indices = @transform_2, window_bounds = array<i64: 1, 1, 8>}, {transform_indices = @transform_3, window_bounds = array<i64: 1>}, {transform_indices = @transform_4, window_bounds = array<i64: 1, 1, 8>}]} {
    %cst = arith.constant 0.000000e+00 : f32
    %0 = vector.broadcast %cst : f32 to vector<1x8xf32>
    %c0_i32 = arith.constant 0 : i32
    %c16_i32 = arith.constant 16 : i32
    %1 = arith.muli %c0_i32, %c16_i32 : i32
    %2 = tpu.assume_multiple %1, 16 : i32
    %c0 = arith.constant 0 : index
    %3 = arith.index_cast %2 : i32 to index
    %c0_0 = arith.constant 0 : index
    %4 = vector.load %arg2[%c0, %3, %c0_0] : memref<1x16x8xf32, #tpu.memory_space<vmem>>, vector<1x16x8xf32>
    %5 = vector.shape_cast %4 : vector<1x16x8xf32> to vector<16x8xf32>
    %c0_1 = arith.constant 0 : index
    %6 = arith.index_cast %2 : i32 to index
    %c0_2 = arith.constant 0 : index
    %7 = vector.load %arg3[%c0_1, %6, %c0_2] : memref<1x16x1xf32, #tpu.memory_space<vmem>>, vector<1x16x1xf32>
    %8 = vector.shape_cast %7 : vector<1x16x1xf32> to vector<16x1xf32>
    %9 = vector.broadcast %8 : vector<16x1xf32> to vector<16x8xf32>
    %10 = arith.mulf %5, %9 : vector<16x8xf32>
    %cst_3 = arith.constant dense<0.000000e+00> : vector<8xf32>
    %11 = vector.multi_reduction <add>, %10, %cst_3 [0] : vector<16x8xf32> to vector<8xf32>
    %12 = vector.shape_cast %11 : vector<8xf32> to vector<1x8xf32>
    %13 = arith.addf %0, %12 : vector<1x8xf32>
    %c1_i32 = arith.constant 1 : i32
    %c0_4 = arith.constant 0 : index
    %c0_5 = arith.constant 0 : index
    %c0_6 = arith.constant 0 : index
    %14 = vector.load %arg4[%c0_4, %c0_5, %c0_6] : memref<1x1x8xf32, #tpu.memory_space<vmem>>, vector<1x1x8xf32>
    %15 = vector.shape_cast %14 : vector<1x1x8xf32> to vector<1x8xf32>
    %c0_7 = arith.constant 0 : index
    %16 = memref.load %arg5[%c0_7] : memref<1xf32, #tpu.memory_space<smem>>
    %17 = vector.broadcast %16 : f32 to vector<1x8xf32>
    %18 = arith.mulf %15, %17 : vector<1x8xf32>
    %19 = arith.addf %13, %18 : vector<1x8xf32>
    %c0_8 = arith.constant 0 : index
    %c0_9 = arith.constant 0 : index
    %c0_10 = arith.constant 0 : index
    %20 = vector.load %arg6[%c0_8, %c0_9, %c0_10] : memref<1x1x8xf32, #tpu.memory_space<vmem>>, vector<1x1x8xf32>
    %21 = vector.shape_cast %20 : vector<1x1x8xf32> to vector<1x8xf32>
    %22 = vector.shape_cast %19 : vector<1x8xf32> to vector<1x1x8xf32>
    tpu.vector_store %arg6[%c0_8, %c0_9, %c0_10], %22 {strides = array<i32>} : memref<1x1x8xf32, #tpu.memory_space<vmem>>, vector<1x1x8xf32>,
    return
  }
  func.func @transform_0(%arg0: i32, %arg1: i32) -> (i32, i32, i32) {
    %c0_i32 = arith.constant 0 : i32
    %c0_i32_0 = arith.constant 0 : i32
    return %arg0, %c0_i32, %arg1 : i32, i32, i32
  }
  func.func @transform_1(%arg0: i32, %arg1: i32) -> (i32, i32, i32) {
    %c0_i32 = arith.constant 0 : i32
    %c0_i32_0 = arith.constant 0 : i32
    %c0_i32_1 = arith.constant 0 : i32
    return %arg0, %c0_i32, %c0_i32_0 : i32, i32, i32
  }
  func.func @transform_2(%arg0: i32, %arg1: i32) -> (i32, i32, i32) {
    %c0_i32 = arith.constant 0 : i32
    %c0_i32_0 = arith.constant 0 : i32
    return %arg0, %c0_i32, %arg1 : i32, i32, i32
  }
  func.func @transform_3(%arg0: i32, %arg1: i32) -> i32 {
    %c0_i32 = arith.constant 0 : i32
    %c0_i32_0 = arith.constant 0 : i32
    return %c0_i32 : i32
  }
  func.func @transform_4(%arg0: i32, %arg1: i32) -> (i32, i32, i32) {
    %c0_i32 = arith.constant 0 : i32
    %c0_i32_0 = arith.constant 0 : i32
    return %arg0, %c0_i32, %arg1 : i32, i32, i32
  }
}

</mosaic_0001>

<bundles_post_ra>
// kernel: tpu_custom_call.1
= control target key start
LH: loop header
LB: loop body
LE: loop exit
PB: predicated region body
PF: predicated region fallthrough
CT: control target
= control target key end

     0   :  { %s690_s0 = inlined_call_operand.vmem [shape: f32[2,16,8], index: 0, kind: input, shape index: {}]   ;;  %s691_s1 = inlined_call_operand.vmem [shape: f32[2,16,1], index: 1, kind: input, shape index: {}]   ;;  %s692_s2 = inlined_call_operand.vmem [shape: f32[2,1,8], index: 2, kind: input, shape index: {}]   ;;  %s693_s3 = inlined_call_operand.<no memory space> [shape: f32[1], index: 3, kind: input, shape index: {}]   ;;  %s694_s4 = inlined_call_operand.hbm [shape: f32[2,1,8], index: 4, kind: output, shape index: {}]  }
   0x1   :  { %9 = sst [smem:[#allocation2]] %s693_s3 }
   0x2   :  { %10 = vsyncpa [#allocation4], 0 }
   0x3   :  { %12 = vsyncpa [#allocation4 + $0x1], 0  ;;  %s587_s17 = smov 0   ;;  %s589_s18 = smov 0  }
   0x4   :  { %s591_s19 = smov 0   ;;  %s593_s20 = smov 0  }
   0x5   :  { %s595_s21 = smov 0   ;;  %s597_s22 = smov 0  }
   0x6 LB: > { %s408_s3 = sadd.s32 4294967295, %s556_s22   ;;  %s409_s23 = sadd.s32 4294967294, %s556_s22   ;;  %s556_s22 = sphi %s597_s22, %s18_s22   ;;  %s552_s21 = sphi %s595_s21, %s701_s21   ;;  %s548_s20 = sphi %s593_s20, %s700_s20   ;;  %s544_s19 = sphi %s591_s19, %s699_s19   ;;  %s540_s18 = sphi %s589_s18, %s698_s18   ;;  %s536_s17 = sphi %s587_s17, %s697_s17  }
   0x7   : > { %s30_s24 = sadd.s32 1, %s552_s21  ;;  %s142_s25 = sadd.s32 1, %s544_s19 }
   0x8   : > { %p32_p0 = scmp.ge.s32.totalorder %s30_s24, 2  ;;  %p152_p1 = scmp.ne.s32.totalorder %s544_s19, %s540_s18 }
   0x9   : > { %p153_p2 = scmp.eq.s32.totalorder %s408_s3, 1  ;;  %p158_p3 = scmp.ne.s32.totalorder %s540_s18, %s536_s17 }
   0xa   : > { %s703_s24 = smov (%p32_p0, %s30_s24), 0  ;;  %p159_p5 = scmp.eq.s32.totalorder %s409_s23, 1 }
   0xb   : > { %p627_p4 = por %p153_p2, %p152_p1  ;;  %s137_s27 = ssub.s32 %s552_s21, %s703_s24 }
   0xc   : > { %p412_p6 = scmp.ge.s32.totalorder %s556_s22, 1  ;;  %p140_p7 = scmp.eq.s32.totalorder %s137_s27, 0 }
   0xd   : > { %p634_p8 = por %p159_p5, %p158_p3  ;;  %p208_p9 = scmp.lt.s32.totalorder %s556_s22, 3 }
   0xe   : > { %s640_s29 = scalar_select %p140_p7, %s544_s19, %s142_s25  }
   0xf   : > { %p209_p10 = pnand %p412_p6, %p208_p9 }
  0x10   : > { %p247_p11 = scmp.lt.s32.totalorder (!%p209_p10), %s548_s20, 1  ;;  %s294_s12 = sld [smem:[#allocation2]] (!%p209_p10) }
  0x11   : > { %212 = sbr.rel (%p209_p10) target bundleno = 172 (0xac), region = 36  ;;  %s245_s16 = sand.u32 (!%p209_p10), 1, %s540_s18  }
  0x12   : > { %s310_s25 = scalar_lea.hbm (!%p209_p10), %s694_s4, %s548_s20  ;;  %s246_s27 = scalar_lea.vmem (!%p209_p10), [#allocation3], %s245_s16 }
  0x13   : > { %s314_s6 = sshll.u32 (!%p209_p10), %s310_s25, 4  ;;  %s498_s10 = scalar_lea.hbm (!%p209_p10), %s694_s4, 2  ;;  %s315_s6 = int_to_ptr.hbm [resolvable:$true] %s314_s6 }
  0x14   : > { %s492_s7 = sshra.s32 (!%p209_p10), %s315_s6, 4  ;;  %s493_s7 = int_to_ptr.hbm [resolvable:$true] %s492_s7 }
  0x15   : > { %p499_p1 = scmp.lt.s32.totalorder (!%p209_p10), %s493_s7, %s694_s4 }
  0x16   : > { %v558_v0 = vmov 0   ;;  %s248_s30 = scalar_select %p247_p11, %s548_s20, 1  ;;  %vm282_vm0 = vcmask 64512   ;;  %v295_v16 = vstv %s294_s12  ;;  %vm298_vm1 = vcmask 57344  }
  0x17   : > { %477 = vset.pattern.permute.xlu0 %v558_v0 }
  0x18   : > { %s419_s5 = sshll.u32 %s248_s30, 4  ;;  %s265_s15 = scalar_lea.vmem %s692_s2, %s248_s30 }
  0x19   : > { %s259_s8 = scalar_lea.vmem %s691_s1, %s419_s5  ;;  %s254_s11 = scalar_lea.vmem %s690_s0, %s419_s5  ;;  %v293_v15 = vld [vmem:[%s265_s15] sm:$0x1] }
  0x1a   : > { %v268_v1 = vld [vmem:[%s259_s8] sm:$0xff]  ;;  %v269_v2 = vld [vmem:[%s259_s8 + $0x8] sm:$0xff]  ;;  %v296_v18 = vmul.f32 %v295_v16, %v293_v15  ;;  %s312_s5 = sshll.u32 %s246_s27, 4  ;;  %s301_s30 = scalar_lea.sflag [#allocation4], %s245_s16  ;;  %s313_s5 = int_to_ptr.vmem [resolvable:$true] %s312_s5 }
  0x1b   : > { %272 = vperm.xlu0 %477, %v268_v1   ;;  %v266_v4 = vld [vmem:[%s254_s11] sm:$0xff]  ;;  %v267_v5 = vld [vmem:[%s254_s11 + $0x8] sm:$0xff]  ;;  %s494_s8 = scalar_lea.hbm %s493_s7, 1 }
  0x1c   : > { %p495_p12 = scmp.ne.s32.totalorder %s493_s7, %s494_s8  ;;  %p500_p2 = scmp.lt.s32.totalorder %s498_s10, %s494_s8 }
  0x1e   : > { %p496_p13 = pnand %p495_p12, %p627_p4  ;;  %p501_p3 = por %p500_p2, %p499_p1 }
  0x20   : > { %p497_p0 = pneg %p496_p13 }
  0x22   : > { %p502_p5 = pnand %p501_p3, %p497_p0 }
  0x23   : > { %277 = vperm.xlu0 %477, %v269_v2  }
  0x8d   : > { %v273_v3 = vpop.permute.xlu0 %272 }
  0x8e   : > { %v280_v6 = vmul.f32 %v273_v3, %v266_v4 }
  0x90   : > { %v283_v9 = vsel %vm282_vm0, %v280_v6, 0.0 }
  0x95   : > { %v278_v7 = vpop.permute.xlu0 %277 }
  0x96   : > { %v281_v8 = vmul.f32 %v278_v7, %v267_v5 }
  0x98   : > { %v284_v10 = vsel %vm282_vm0, %v281_v8, 0.0 }
  0x99   : > { %v285_v11 = vadd.f32 %v284_v10, %v283_v9 }
  0x9b   : > { %v286_v12 = vrot.slane %v285_v11, 4 }
  0x9d   : > { %v287_v13 = vadd.f32 %v286_v12, %v285_v11 }
  0x9f   : > { %v288_v14 = vrot.slane %v287_v13, 2 }
  0xa1   : > { %v289_v17 = vadd.f32 %v288_v14, %v287_v13 }
  0xa3   : > { %v290_v19 = vrot.slane %v289_v17, 1 }
  0xa5   : > { %v291_v20 = vadd.f32 %v290_v19, %v289_v17 }
  0xa7   : > { %v297_v21 = vadd.f32 %v296_v18, %v291_v20 }
  0xa9   : > { %299 = vst.msk [vmem:[%s246_s27] sm:$0x1] %vm298_vm1, %v297_v21 }
  0xaa   : > { %505 = shalt.err (!%p502_p5)
}
  0xab   : > { %421 = dma.vmem_to_hbm [thread:$0]  (%p627_p4), %s313_s5, 16, %s315_s6, %s301_s30  }
  0xac PF: > { %p427_p6 = scmp.ge.s32.totalorder %s556_s22, 2  ;;  %s326_s13 = sand.u32 1, %s536_s17  }
  0xad   : > { %s327_s14 = scalar_lea.sflag [#allocation4], %s326_s13 }
  0xae   : > { %p424_p7 = pnand %p427_p6, %p634_p8 }
  0xb0   : > { %p425_p9 = pneg %p424_p7 }
  0xb2   : > { %531 = dma.done.wait (%p425_p9), %s327_s14, 16  }
  0xb3   : > { %533 = vsyncadd (%p425_p9), %s327_s14, 4294967280  ;;  %s18_s22 = sadd.s32 1, %s556_s22   ;;  %s697_s17 = smov %s540_s18 }
  0xb4   : > { %p15_p10 = scmp.ge.s32.totalorder %s18_s22, 4   ;;  %s698_s18 = smov %s544_s19 }
  0xb5   : > { %s699_s19 = smov %s640_s29  ;;  %s700_s20 = smov %s552_s21 }
  0xb6   : > { %s701_s21 = smov %s703_s24  ;;  %17 = sbr.rel (!%p15_p10) target bundleno = 6 (0x6), region = 77 }
  0xbb   :  { %332 = vsyncpa [#allocation4], 1 }
  0xbc   :  { %334 = vsyncpa [#allocation4 + $0x1], 1 }

</bundles_post_ra>
